<compile_context>
chip_gen: v7x
topology: tpu7x:2x2x1
jax: 0.10.0
libtpu: 0.0.40
codegen_flags: <defaults>
</compile_context>

<pallas_src>
import functools

import jax
import jax.numpy as jnp
import numpy as np
from jax import lax
from jax.experimental import pallas as pl
from jax.experimental.pallas import tpu as pltpu

EPS = 1e-5  # PyTorch BatchNorm2d default


# -----------------------------------------------------------------------------
# Host-side helpers
# -----------------------------------------------------------------------------
def _round_up(v, m):
    return (v + m - 1) // m * m


def _conv3x3_tap_masks(height, width, n_images):
    """(9, N*H*W) f32 validity masks for the 9 conv taps, tap order (dh, dw) row-major.

    A position is valid for tap (dh, dw) iff the source pixel (r+dh, c+dw) lies inside
    the image.  The masks therefore zero every element that pltpu.roll wraps across a
    row, an image boundary, or the end of the concatenated batch.
    """
    s = height * width
    r = np.arange(s) // width
    c = np.arange(s) % width
    masks = np.zeros((9, s), np.float32)
    t = 0
    for dh in (-1, 0, 1):
        for dw in (-1, 0, 1):
            valid = (r + dh >= 0) & (r + dh < height) & (c + dw >= 0) & (c + dw < width)
            masks[t] = valid.astype(np.float32)
            t += 1
    return jnp.asarray(np.tile(masks, (1, n_images)))  # tile per image on the lane axis


def _pad_rows(a, rows, fill=0.0):
    """Zero/constant-pad a 2-D array along axis 0 to `rows` rows."""
    if a.shape[0] == rows:
        return a
    out = jnp.full((rows,) + a.shape[1:], fill, a.dtype)
    return out.at[: a.shape[0]].set(a)


# -----------------------------------------------------------------------------
# Fused kernel (single invocation, everything resident in VMEM/vregs)
# -----------------------------------------------------------------------------
def _fused_preact_block_kernel(
    x_ref,            # (Cin_p, L)     input, L = N*H*W (images concatenated on lanes)
    g1_ref, b1_ref,   # (Cin_p, 1)     BN1 gamma / beta
    g2_ref, b2_ref,   # (Cmid_p, 1)    BN2 gamma / beta
    w1_ref,           # (Cmid_p, 9*Cin_p)   conv1 weights, im2col layout, matmul dtype
    w2_ref,           # (Cout_p, 9*Cmid_p)  conv2 weights, im2col layout, matmul dtype
    mask_ref,         # (9, L)         per-tap validity masks (f32)
    *rest,            # [wds_ref (Cout_p, Cin_p)] , o_ref (Cout_p, L)
    width,
    matmul_dtype,
    has_downsample,
):
    if has_downsample:
        wds_ref, o_ref = rest
    else:
        (o_ref,) = rest

    total = x_ref.shape[-1]          # static: N * H * W
    inv_cnt = 1.0 / total

    x = x_ref[...]

    taps = [(dh, dw) for dh in (-1, 0, 1) for dw in (-1, 0, 1)]
    # Hoist mask loads: read each non-center mask row once, reuse for both convs.
    mask_rows = {t: mask_ref[t : t + 1, :] for t in range(9) if t != 4}

    def im2col_patch(act):
        """(C, L) activation -> (9*C, L) patch via XLU roll + mask, built in registers."""
        pieces = []
        for t, (dh, dw) in enumerate(taps):
            off = dh * width + dw
            if off == 0:
                pieces.append(act)                       # center tap: no shift, all-ones mask
            else:
                shifted = pltpu.roll(act, (-off) % total, axis=1)   # XLU lane rotation
                pieces.append(shifted * mask_rows[t])
        return jnp.concatenate(pieces, axis=0)

    def bn_relu(z, g, b):
        """Training-mode BN (biased variance, two-pass) + ReLU, all in f32."""
        m = jnp.sum(z, axis=1, keepdims=True) * inv_cnt
        zc = z - m
        v = jnp.sum(zc * zc, axis=1, keepdims=True) * inv_cnt
        sc = g * lax.rsqrt(v + EPS)
        return jnp.maximum(z * sc + (b - m * sc), 0.0)

    # ---- y = conv1(relu(bn1(x))) : one batched im2col matmul -------------------------
    a1 = bn_relu(x, g1_ref[...], b1_ref[...])
    y = jnp.dot(w1_ref[...], im2col_patch(a1).astype(matmul_dtype),
                preferred_element_type=jnp.float32)

    # ---- out = conv2(relu(bn2(y))) ----------------------------------------------------
    a2 = bn_relu(y, g2_ref[...], b2_ref[...])
    out = jnp.dot(w2_ref[...], im2col_patch(a2).astype(matmul_dtype),
                  preferred_element_type=jnp.float32)

    # ---- residual shortcut -------------------------------------------------------------
    if has_downsample:
        out = out + jnp.dot(wds_ref[...], x.astype(matmul_dtype),
                            preferred_element_type=jnp.float32)
    else:
        out = out + x                                    # plain add, no identity matmul

    o_ref[...] = out


# -----------------------------------------------------------------------------
# Wrapper
# -----------------------------------------------------------------------------
def preact_block_forward(x_nchw, params, *, matmul_dtype=jnp.bfloat16):
    """Pre-activation residual block forward.  Input/output are NCHW like PyTorch."""
    n, c_in, height, width = x_nchw.shape
    spatial = height * width
    total = n * spatial

    w1 = params["conv1_w"].astype(jnp.float32)   # (3, 3, Cin, Cmid)  HWIO
    w2 = params["conv2_w"].astype(jnp.float32)   # (3, 3, Cmid, Cout) HWIO
    c_mid = w1.shape[-1]
    c_out = w2.shape[-1]

    # Pad channel counts to a multiple of 8 (f32 sublane tile) so all in-kernel sublane
    # concatenations / layouts are tile-aligned.  Padding is inert (zero rows / columns).
    c_in_p = _round_up(c_in, 8)
    c_mid_p = _round_up(c_mid, 8)
    c_out_p = _round_up(c_out, 8)

    # im2col weight layout: (Cout_p, 9*Cin_p), column = (kh*3 + kw)*Cin_p + ci,
    # matching the kernel's tap-major / channel-minor patch row order.
    w1_p = jnp.zeros((3, 3, c_in_p, c_mid_p), jnp.float32).at[:, :, :c_in, :c_mid].set(w1)
    w2_p = jnp.zeros((3, 3, c_mid_p, c_out_p), jnp.float32).at[:, :, :c_mid, :c_out].set(w2)
    w1_mat = w1_p.reshape(9 * c_in_p, c_mid_p).T.astype(matmul_dtype)
    w2_mat = w2_p.reshape(9 * c_mid_p, c_out_p).T.astype(matmul_dtype)

    g1 = _pad_rows(params["bn1_gamma"].astype(jnp.float32).reshape(c_in, 1), c_in_p, 1.0)
    b1 = _pad_rows(params["bn1_beta"].astype(jnp.float32).reshape(c_in, 1), c_in_p, 0.0)
    g2 = _pad_rows(params["bn2_gamma"].astype(jnp.float32).reshape(c_mid, 1), c_mid_p, 1.0)
    b2 = _pad_rows(params["bn2_beta"].astype(jnp.float32).reshape(c_mid, 1), c_mid_p, 0.0)

    masks = _conv3x3_tap_masks(height, width, n)                      # (9, N*S)

    # NCHW -> (C, N*H*W): channels on sublanes, the whole batch's H*W on the 128-lane
    # axis (lane-dense, 512 wide here) => one batched matmul per conv, full-width vst.
    x_cl = jnp.transpose(x_nchw.astype(jnp.float32), (1, 0, 2, 3)).reshape(c_in, total)
    x_cl = _pad_rows(x_cl, c_in_p, 0.0)

    has_downsample = "down_w" in params
    args = [x_cl, g1, b1, g2, b2, w1_mat, w2_mat, masks]
    if has_downsample:
        wds = jnp.zeros((c_out_p, c_in_p), jnp.float32).at[:c_out, :c_in].set(
            params["down_w"].astype(jnp.float32).T)                   # (Cout_p, Cin_p)
        args.append(wds.astype(matmul_dtype))
    else:
        assert c_in == c_out

    kernel = functools.partial(
        _fused_preact_block_kernel,
        width=width, matmul_dtype=matmul_dtype, has_downsample=has_downsample)

    out_cl = pl.pallas_call(
        kernel,
        out_shape=jax.ShapeDtypeStruct((c_out_p, total), jnp.float32),
    )(*args)

    out = out_cl[:c_out].reshape(c_out, n, height, width)
    return jnp.transpose(out, (1, 0, 2, 3))


# -----------------------------------------------------------------------------
# Pure-JAX reference (for correctness check)
# -----------------------------------------------------------------------------
def reference_forward(x_nchw, params, eps=EPS):
    x = jnp.transpose(x_nchw, (0, 2, 3, 1)).astype(jnp.float32)

    def bn_relu(z, g, b):
        m = jnp.mean(z, axis=(0, 1, 2))
        v = jnp.var(z, axis=(0, 1, 2))
        return jnp.maximum((z - m) / jnp.sqrt(v + eps) * g + b, 0.0)

    def conv3x3_ref(z, w):
        return lax.conv_general_dilated(
            z, w, (1, 1), ((1, 1), (1, 1)),
            dimension_numbers=("NHWC", "HWIO", "NHWC"))

    if "down_w" in params:
        w11 = params["down_w"].reshape(1, 1, *params["down_w"].shape)
        ds = lax.conv_general_dilated(
            x, w11, (1, 1), ((0, 0), (0, 0)),
            dimension_numbers=("NHWC", "HWIO", "NHWC"))
    else:
        ds = x

    y = conv3x3_ref(bn_relu(x, params["bn1_gamma"], params["bn1_beta"]), params["conv1_w"])
    out = conv3x3_ref(bn_relu(y, params["bn2_gamma"], params["bn2_beta"]), params["conv2_w"]) + ds
    return jnp.transpose(out, (0, 3, 1, 2))


# -----------------------------------------------------------------------------
# Main
# -----------------------------------------------------------------------------
if __name__ == "__main__":
    in_planes, planes, stride = 4, 8, 1
    N, H, W = 2, 16, 16

    key = jax.random.PRNGKey(0)
    k1, k2, k3, kx = jax.random.split(key, 4)

    params = {
        # conv weights stored HWIO (PyTorch OIHW -> transpose (2, 3, 1, 0))
        "conv1_w": 0.1 * jax.random.normal(k1, (3, 3, in_planes, planes), jnp.float32),
        "conv2_w": 0.1 * jax.random.normal(k2, (3, 3, planes, planes), jnp.float32),
        "bn1_gamma": jnp.ones((in_planes,), jnp.float32),   # PyTorch BN init
        "bn1_beta": jnp.zeros((in_planes,), jnp.float32),
        "bn2_gamma": jnp.ones((planes,), jnp.float32),
        "bn2_beta": jnp.zeros((planes,), jnp.float32),
    }
    # stride != 1 or in_planes != planes -> 1x1 downsample conv (here: channel mismatch)
    if stride != 1 or in_planes != planes:
        params["down_w"] = 0.1 * jax.random.normal(k3, (in_planes, planes), jnp.float32)

    x = jax.random.normal(kx, (N, in_planes, H, W), jnp.float32)  # NCHW like PyTorch

    ref = jax.block_until_ready(reference_forward(x, params))

    # 1) Exact-parity path: f32 matmuls, tight tolerance.
    out_f32 = jax.block_until_ready(
        preact_block_forward(x, params, matmul_dtype=jnp.float32))
    assert out_f32.shape == (N, planes, H, W), out_f32.shape
    err_f32 = float(jnp.max(jnp.abs(out_f32 - ref)))
    assert jnp.allclose(out_f32, ref, atol=2e-3, rtol=2e-3), err_f32

    # 2) Performance path (default): bf16 at the MXU boundary, f32 accumulation and
    #    f32 BN/ReLU math; tolerance reflects bf16 matmul quantization.
    out_bf16 = jax.block_until_ready(
        preact_block_forward(x, params, matmul_dtype=jnp.bfloat16))
    assert out_bf16.shape == (N, planes, H, W), out_bf16.shape
    err_bf16 = float(jnp.max(jnp.abs(out_bf16 - ref)))
    assert jnp.allclose(out_bf16, ref, atol=4e-2, rtol=4e-2), err_bf16

    print("KERNEL_OK")
</pallas_src>

<mosaic_0001>
module attributes {stable_mosaic.version = 11 : i64} {
  func.func @_fused_preact_block_kernel(%arg0: memref<8x512xf32, #tpu.memory_space<vmem>>, %arg1: memref<8x1xf32, #tpu.memory_space<vmem>>, %arg2: memref<8x1xf32, #tpu.memory_space<vmem>>, %arg3: memref<8x1xf32, #tpu.memory_space<vmem>>, %arg4: memref<8x1xf32, #tpu.memory_space<vmem>>, %arg5: memref<8x72xf32, #tpu.memory_space<vmem>>, %arg6: memref<8x72xf32, #tpu.memory_space<vmem>>, %arg7: memref<9x512xf32, #tpu.memory_space<vmem>>, %arg8: memref<8x8xf32, #tpu.memory_space<vmem>>, %arg9: memref<8x512xf32, #tpu.memory_space<vmem>>) attributes {dimension_semantics = [], scalar_prefetch = 0 : i64, scratch_operands = 0 : i64, tpu.core_type = #tpu.core_type<tc>} {
    %c0 = arith.constant 0 : index
    %c0_0 = arith.constant 0 : index
    %0 = vector.load %arg0[%c0, %c0_0] : memref<8x512xf32, #tpu.memory_space<vmem>>, vector<8x512xf32>
    %c0_1 = arith.constant 0 : index
    %c0_2 = arith.constant 0 : index
    %1 = vector.load %arg7[%c0_1, %c0_2] : memref<9x512xf32, #tpu.memory_space<vmem>>, vector<1x512xf32>
    %c1 = arith.constant 1 : index
    %c0_3 = arith.constant 0 : index
    %2 = vector.load %arg7[%c1, %c0_3] : memref<9x512xf32, #tpu.memory_space<vmem>>, vector<1x512xf32>
    %c2 = arith.constant 2 : index
    %c0_4 = arith.constant 0 : index
    %3 = vector.load %arg7[%c2, %c0_4] : memref<9x512xf32, #tpu.memory_space<vmem>>, vector<1x512xf32>
    %c3 = arith.constant 3 : index
    %c0_5 = arith.constant 0 : index
    %4 = vector.load %arg7[%c3, %c0_5] : memref<9x512xf32, #tpu.memory_space<vmem>>, vector<1x512xf32>
    %c5 = arith.constant 5 : index
    %c0_6 = arith.constant 0 : index
    %5 = vector.load %arg7[%c5, %c0_6] : memref<9x512xf32, #tpu.memory_space<vmem>>, vector<1x512xf32>
    %c6 = arith.constant 6 : index
    %c0_7 = arith.constant 0 : index
    %6 = vector.load %arg7[%c6, %c0_7] : memref<9x512xf32, #tpu.memory_space<vmem>>, vector<1x512xf32>
    %c7 = arith.constant 7 : index
    %c0_8 = arith.constant 0 : index
    %7 = vector.load %arg7[%c7, %c0_8] : memref<9x512xf32, #tpu.memory_space<vmem>>, vector<1x512xf32>
    %c8 = arith.constant 8 : index
    %c0_9 = arith.constant 0 : index
    %8 = vector.load %arg7[%c8, %c0_9] : memref<9x512xf32, #tpu.memory_space<vmem>>, vector<1x512xf32>
    %c0_10 = arith.constant 0 : index
    %c0_11 = arith.constant 0 : index
    %9 = vector.load %arg1[%c0_10, %c0_11] : memref<8x1xf32, #tpu.memory_space<vmem>>, vector<8x1xf32>
    %c0_12 = arith.constant 0 : index
    %c0_13 = arith.constant 0 : index
    %10 = vector.load %arg2[%c0_12, %c0_13] : memref<8x1xf32, #tpu.memory_space<vmem>>, vector<8x1xf32>
    %cst = arith.constant dense<0.000000e+00> : vector<8xf32>
    %11 = vector.multi_reduction <add>, %0, %cst [1] : vector<8x512xf32> to vector<8xf32>
    %12 = vector.shape_cast %11 : vector<8xf32> to vector<8x1xf32>
    %cst_14 = arith.constant 0.001953125 : f32
    %13 = vector.broadcast %cst_14 : f32 to vector<8x1xf32>
    %14 = arith.mulf %12, %13 : vector<8x1xf32>
    %15 = vector.broadcast %14 : vector<8x1xf32> to vector<8x512xf32>
    %16 = arith.subf %0, %15 : vector<8x512xf32>
    %17 = arith.mulf %16, %16 : vector<8x512xf32>
    %cst_15 = arith.constant dense<0.000000e+00> : vector<8xf32>
    %18 = vector.multi_reduction <add>, %17, %cst_15 [1] : vector<8x512xf32> to vector<8xf32>
    %19 = vector.shape_cast %18 : vector<8xf32> to vector<8x1xf32>
    %cst_16 = arith.constant 0.001953125 : f32
    %20 = vector.broadcast %cst_16 : f32 to vector<8x1xf32>
    %21 = arith.mulf %19, %20 : vector<8x1xf32>
    %cst_17 = arith.constant 9.99999974E-6 : f32
    %22 = vector.broadcast %cst_17 : f32 to vector<8x1xf32>
    %23 = arith.addf %21, %22 : vector<8x1xf32>
    %24 = math.rsqrt %23 : vector<8x1xf32>
    %25 = arith.mulf %9, %24 : vector<8x1xf32>
    %26 = vector.broadcast %25 : vector<8x1xf32> to vector<8x512xf32>
    %27 = arith.mulf %0, %26 : vector<8x512xf32>
    %28 = arith.mulf %14, %25 : vector<8x1xf32>
    %29 = arith.subf %10, %28 : vector<8x1xf32>
    %30 = vector.broadcast %29 : vector<8x1xf32> to vector<8x512xf32>
    %31 = arith.addf %27, %30 : vector<8x512xf32>
    %cst_18 = arith.constant 0.000000e+00 : f32
    %32 = vector.broadcast %cst_18 : f32 to vector<8x512xf32>
    %33 = arith.maximumf %31, %32 : vector<8x512xf32>
    %c0_19 = arith.constant 0 : index
    %c0_20 = arith.constant 0 : index
    %34 = vector.load %arg5[%c0_19, %c0_20] : memref<8x72xf32, #tpu.memory_space<vmem>>, vector<8x72xf32>
    %c17_i32 = arith.constant 17 : i32
    %35 = tpu.dynamic_rotate %33 by %c17_i32 dim 1 : vector<8x512xf32>, i32 -> vector<8x512xf32>
    %36 = vector.broadcast %1 : vector<1x512xf32> to vector<8x512xf32>
    %37 = arith.mulf %35, %36 : vector<8x512xf32>
    %c16_i32 = arith.constant 16 : i32
    %38 = tpu.dynamic_rotate %33 by %c16_i32 dim 1 : vector<8x512xf32>, i32 -> vector<8x512xf32>
    %39 = vector.broadcast %2 : vector<1x512xf32> to vector<8x512xf32>
    %40 = arith.mulf %38, %39 : vector<8x512xf32>
    %c15_i32 = arith.constant 15 : i32
    %41 = tpu.dynamic_rotate %33 by %c15_i32 dim 1 : vector<8x512xf32>, i32 -> vector<8x512xf32>
    %42 = vector.broadcast %3 : vector<1x512xf32> to vector<8x512xf32>
    %43 = arith.mulf %41, %42 : vector<8x512xf32>
    %c1_i32 = arith.constant 1 : i32
    %44 = tpu.dynamic_rotate %33 by %c1_i32 dim 1 : vector<8x512xf32>, i32 -> vector<8x512xf32>
    %45 = vector.broadcast %4 : vector<1x512xf32> to vector<8x512xf32>
    %46 = arith.mulf %44, %45 : vector<8x512xf32>
    %c511_i32 = arith.constant 511 : i32
    %47 = tpu.dynamic_rotate %33 by %c511_i32 dim 1 : vector<8x512xf32>, i32 -> vector<8x512xf32>
    %48 = vector.broadcast %5 : vector<1x512xf32> to vector<8x512xf32>
    %49 = arith.mulf %47, %48 : vector<8x512xf32>
    %c497_i32 = arith.constant 497 : i32
    %50 = tpu.dynamic_rotate %33 by %c497_i32 dim 1 : vector<8x512xf32>, i32 -> vector<8x512xf32>
    %51 = vector.broadcast %6 : vector<1x512xf32> to vector<8x512xf32>
    %52 = arith.mulf %50, %51 : vector<8x512xf32>
    %c496_i32 = arith.constant 496 : i32
    %53 = tpu.dynamic_rotate %33 by %c496_i32 dim 1 : vector<8x512xf32>, i32 -> vector<8x512xf32>
    %54 = vector.broadcast %7 : vector<1x512xf32> to vector<8x512xf32>
    %55 = arith.mulf %53, %54 : vector<8x512xf32>
    %c495_i32 = arith.constant 495 : i32
    %56 = tpu.dynamic_rotate %33 by %c495_i32 dim 1 : vector<8x512xf32>, i32 -> vector<8x512xf32>
    %57 = vector.broadcast %8 : vector<1x512xf32> to vector<8x512xf32>
    %58 = arith.mulf %56, %57 : vector<8x512xf32>
    %59 = tpu.concatenate %37, %40, %43, %46, %33, %49, %52, %55, %58 in 0 : vector<8x512xf32>, vector<8x512xf32>, vector<8x512xf32>, vector<8x512xf32>, vector<8x512xf32>, vector<8x512xf32>, vector<8x512xf32>, vector<8x512xf32>, vector<8x512xf32> -> vector<72x512xf32>
    %cst_21 = arith.constant dense<0.000000e+00> : vector<8x512xf32>
    %60 = tpu.matmul %34, %59, %cst_21 {dimension_numbers = #tpu.dot_dimension_numbers<[1], [0], [0], [1], [0, 0, 1, 1], [], []>} : vector<8x72xf32>, vector<72x512xf32>, vector<8x512xf32> -> vector<8x512xf32>
    %c0_22 = arith.constant 0 : index
    %c0_23 = arith.constant 0 : index
    %61 = vector.load %arg3[%c0_22, %c0_23] : memref<8x1xf32, #tpu.memory_space<vmem>>, vector<8x1xf32>
    %c0_24 = arith.constant 0 : index
    %c0_25 = arith.constant 0 : index
    %62 = vector.load %arg4[%c0_24, %c0_25] : memref<8x1xf32, #tpu.memory_space<vmem>>, vector<8x1xf32>
    %cst_26 = arith.constant dense<0.000000e+00> : vector<8xf32>
    %63 = vector.multi_reduction <add>, %60, %cst_26 [1] : vector<8x512xf32> to vector<8xf32>
    %64 = vector.shape_cast %63 : vector<8xf32> to vector<8x1xf32>
    %cst_27 = arith.constant 0.001953125 : f32
    %65 = vector.broadcast %cst_27 : f32 to vector<8x1xf32>
    %66 = arith.mulf %64, %65 : vector<8x1xf32>
    %67 = vector.broadcast %66 : vector<8x1xf32> to vector<8x512xf32>
    %68 = arith.subf %60, %67 : vector<8x512xf32>
    %69 = arith.mulf %68, %68 : vector<8x512xf32>
    %cst_28 = arith.constant dense<0.000000e+00> : vector<8xf32>
    %70 = vector.multi_reduction <add>, %69, %cst_28 [1] : vector<8x512xf32> to vector<8xf32>
    %71 = vector.shape_cast %70 : vector<8xf32> to vector<8x1xf32>
    %cst_29 = arith.constant 0.001953125 : f32
    %72 = vector.broadcast %cst_29 : f32 to vector<8x1xf32>
    %73 = arith.mulf %71, %72 : vector<8x1xf32>
    %cst_30 = arith.constant 9.99999974E-6 : f32
    %74 = vector.broadcast %cst_30 : f32 to vector<8x1xf32>
    %75 = arith.addf %73, %74 : vector<8x1xf32>
    %76 = math.rsqrt %75 : vector<8x1xf32>
    %77 = arith.mulf %61, %76 : vector<8x1xf32>
    %78 = vector.broadcast %77 : vector<8x1xf32> to vector<8x512xf32>
    %79 = arith.mulf %60, %78 : vector<8x512xf32>
    %80 = arith.mulf %66, %77 : vector<8x1xf32>
    %81 = arith.subf %62, %80 : vector<8x1xf32>
    %82 = vector.broadcast %81 : vector<8x1xf32> to vector<8x512xf32>
    %83 = arith.addf %79, %82 : vector<8x512xf32>
    %cst_31 = arith.constant 0.000000e+00 : f32
    %84 = vector.broadcast %cst_31 : f32 to vector<8x512xf32>
    %85 = arith.maximumf %83, %84 : vector<8x512xf32>
    %c0_32 = arith.constant 0 : index
    %c0_33 = arith.constant 0 : index
    %86 = vector.load %arg6[%c0_32, %c0_33] : memref<8x72xf32, #tpu.memory_space<vmem>>, vector<8x72xf32>
    %c17_i32_34 = arith.constant 17 : i32
    %87 = tpu.dynamic_rotate %85 by %c17_i32_34 dim 1 : vector<8x512xf32>, i32 -> vector<8x512xf32>
    %88 = vector.broadcast %1 : vector<1x512xf32> to vector<8x512xf32>
    %89 = arith.mulf %87, %88 : vector<8x512xf32>
    %c16_i32_35 = arith.constant 16 : i32
    %90 = tpu.dynamic_rotate %85 by %c16_i32_35 dim 1 : vector<8x512xf32>, i32 -> vector<8x512xf32>
    %91 = vector.broadcast %2 : vector<1x512xf32> to vector<8x512xf32>
    %92 = arith.mulf %90, %91 : vector<8x512xf32>
    %c15_i32_36 = arith.constant 15 : i32
    %93 = tpu.dynamic_rotate %85 by %c15_i32_36 dim 1 : vector<8x512xf32>, i32 -> vector<8x512xf32>
    %94 = vector.broadcast %3 : vector<1x512xf32> to vector<8x512xf32>
    %95 = arith.mulf %93, %94 : vector<8x512xf32>
    %c1_i32_37 = arith.constant 1 : i32
    %96 = tpu.dynamic_rotate %85 by %c1_i32_37 dim 1 : vector<8x512xf32>, i32 -> vector<8x512xf32>
    %97 = vector.broadcast %4 : vector<1x512xf32> to vector<8x512xf32>
    %98 = arith.mulf %96, %97 : vector<8x512xf32>
    %c511_i32_38 = arith.constant 511 : i32
    %99 = tpu.dynamic_rotate %85 by %c511_i32_38 dim 1 : vector<8x512xf32>, i32 -> vector<8x512xf32>
    %100 = vector.broadcast %5 : vector<1x512xf32> to vector<8x512xf32>
    %101 = arith.mulf %99, %100 : vector<8x512xf32>
    %c497_i32_39 = arith.constant 497 : i32
    %102 = tpu.dynamic_rotate %85 by %c497_i32_39 dim 1 : vector<8x512xf32>, i32 -> vector<8x512xf32>
    %103 = vector.broadcast %6 : vector<1x512xf32> to vector<8x512xf32>
    %104 = arith.mulf %102, %103 : vector<8x512xf32>
    %c496_i32_40 = arith.constant 496 : i32
    %105 = tpu.dynamic_rotate %85 by %c496_i32_40 dim 1 : vector<8x512xf32>, i32 -> vector<8x512xf32>
    %106 = vector.broadcast %7 : vector<1x512xf32> to vector<8x512xf32>
    %107 = arith.mulf %105, %106 : vector<8x512xf32>
    %c495_i32_41 = arith.constant 495 : i32
    %108 = tpu.dynamic_rotate %85 by %c495_i32_41 dim 1 : vector<8x512xf32>, i32 -> vector<8x512xf32>
    %109 = vector.broadcast %8 : vector<1x512xf32> to vector<8x512xf32>
    %110 = arith.mulf %108, %109 : vector<8x512xf32>
    %111 = tpu.concatenate %89, %92, %95, %98, %85, %101, %104, %107, %110 in 0 : vector<8x512xf32>, vector<8x512xf32>, vector<8x512xf32>, vector<8x512xf32>, vector<8x512xf32>, vector<8x512xf32>, vector<8x512xf32>, vector<8x512xf32>, vector<8x512xf32> -> vector<72x512xf32>
    %cst_42 = arith.constant dense<0.000000e+00> : vector<8x512xf32>
    %112 = tpu.matmul %86, %111, %cst_42 {dimension_numbers = #tpu.dot_dimension_numbers<[1], [0], [0], [1], [0, 0, 1, 1], [], []>} : vector<8x72xf32>, vector<72x512xf32>, vector<8x512xf32> -> vector<8x512xf32>
    %c0_43 = arith.constant 0 : index
    %c0_44 = arith.constant 0 : index
    %113 = vector.load %arg8[%c0_43, %c0_44] : memref<8x8xf32, #tpu.memory_space<vmem>>, vector<8x8xf32>
    %cst_45 = arith.constant dense<0.000000e+00> : vector<8x512xf32>
    %114 = tpu.matmul %113, %0, %cst_45 {dimension_numbers = #tpu.dot_dimension_numbers<[1], [0], [0], [1], [0, 0, 1, 1], [], []>} : vector<8x8xf32>, vector<8x512xf32>, vector<8x512xf32> -> vector<8x512xf32>
    %115 = arith.addf %112, %114 : vector<8x512xf32>
    %c0_46 = arith.constant 0 : index
    %c0_47 = arith.constant 0 : index
    %116 = vector.load %arg9[%c0_46, %c0_47] : memref<8x512xf32, #tpu.memory_space<vmem>>, vector<8x512xf32>
    tpu.vector_store %arg9[%c0_46, %c0_47], %115 {strides = array<i32>} : memref<8x512xf32, #tpu.memory_space<vmem>>, vector<8x512xf32>,
    return
  }
}

</mosaic_0001>

<bundles_post_ra>
// kernel: tpu_custom_call.1
= control target key start
LH: loop header
LB: loop body
LE: loop exit
PB: predicated region body
PF: predicated region fallthrough
CT: control target
= control target key end

     0   :  { %14 = vsyncpa [#allocation3], 0  ;;  %s1820_s0 = inlined_call_operand.vmem [shape: f32[8,512], index: 0, kind: input, shape index: {}]   ;;  %s1821_s1 = inlined_call_operand.vmem [shape: f32[8,1], index: 1, kind: input, shape index: {}]   ;;  %s1822_s2 = inlined_call_operand.vmem [shape: f32[8,1], index: 2, kind: input, shape index: {}]   ;;  %s1823_s3 = inlined_call_operand.vmem [shape: f32[8,1], index: 3, kind: input, shape index: {}]   ;;  %s1824_s4 = inlined_call_operand.vmem [shape: f32[8,1], index: 4, kind: input, shape index: {}]   ;;  %s1825_s5 = inlined_call_operand.vmem [shape: f32[8,72], index: 5, kind: input, shape index: {}]   ;;  %s1826_s6 = inlined_call_operand.vmem [shape: f32[8,72], index: 6, kind: input, shape index: {}]   ;;  %s1827_s7 = inlined_call_operand.hbm [shape: f32[9,512], index: 7, kind: input, shape index: {}]   ;;  %s1828_s8 = inlined_call_operand.vmem [shape: f32[8,8], index: 8, kind: input, shape index: {}]   ;;  %s1829_s9 = inlined_call_operand.hbm [shape: f32[8,512], index: 9, kind: output, shape index: {}]  }
   0x1   :  { %15 = vsyncpa [#allocation4], 0  ;;  %s1199_s30 = smov [#allocation2]   ;;  %s1151_s13 = scalar_lea.hbm %s1827_s7, 1024 }
   0x2   :  { %s35_s10 = sshll.u32 %s1199_s30, 4  ;;  %p1152_p0 = scmp.ne.s32.totalorder %s1827_s7, %s1151_s13  ;;  %s36_s10 = int_to_ptr.vmem [resolvable:$true] %s35_s10 }
   0x3   :  { %p1155_p1 = scmp.lt.u32.totalorder %s1151_s13, %s1827_s7 }
   0x5   :  { %p1157_p2 = pnand %p1155_p1, %p1152_p0 }
   0x7   :  { %1160 = shalt.err (!%p1157_p2)
}
   0x8   :  { %s1161_s18 = scalar_lea.vmem %s36_s10, 1024  ;;  %p1166_p4 = scmp.lt.s32.totalorder %s36_s10, %s36_s10 }
   0x9   :  { %p1162_p3 = scmp.ne.s32.totalorder %s36_s10, %s1161_s18  ;;  %p1167_p5 = scmp.lt.s32.totalorder %s1161_s18, %s1161_s18 }
   0xb   :  { %p1168_p6 = por %p1167_p5, %p1166_p4 }
   0xd   :  { %p1169_p7 = pnand %p1168_p6, %p1162_p3 }
   0xf   :  { %1172 = shalt.err (!%p1169_p7)
}
  0x10   :  { %s1200_s19 = smov 512   ;;  %s1201_s20 = smov 32  }
  0x11   :  { %41 = dma.hbm_to_vmem [thread:$0]  %s1827_s7, 1024, %s36_s10, [#allocation3], %s1200_s19, %s1200_s19, %s1201_s20  }
  0x12   :  { %1195 = dma.done.wait [#allocation3], 1024  }
  0x13   :  { %1196 = vsyncadd [#allocation3], 4294966272  ;;  %v1278_v0 = vld [vmem:[%s1820_s0] sm:$0xff]  ;;  %v1283_v1 = vld [vmem:[%s1820_s0 + $0x8] sm:$0xff]  ;;  %v1202_v20 = vmov 0   ;;  %s1205_s12 = smov 15   ;;  %v124_v45 = vlaneseq }
  0x14   :  { %v1288_v2 = vld [vmem:[%s1820_s0 + $0x10] sm:$0xff]  ;;  %v68_v3 = vadd.f32 %v1283_v1, %v1278_v0  ;;  %v1295_v4 = vld [vmem:[%s1820_s0 + $0x18] sm:$0xff]  ;;  %1145 = vset.pattern.permute.xlu1 %v1202_v20  ;;  %1146 = vset.pattern.permute.xlu0 %v1202_v20  ;;  %v66_v24 = vld [vmem:[%s1821_s1] sm:$0xff]  ;;  %s1203_s1 = smov 17   ;;  %s1206_s13 = smov 1   ;;  %v1211_v44 = vmov 0.0  }
  0x15   :  { %v67_v27 = vld [vmem:[%s1822_s2] sm:$0xff]  ;;  %s1204_s2 = smov 16   ;;  %s1207_s14 = smov 127   ;;  %490 = vmatprep.mubr.f32.mxu0 %v1211_v44  ;;  %561 = vmatprep.mubr.f32.mxu1 %v1211_v44  ;;  %v133_v46 = vshrl.u32 %v124_v45, 7  ;;  %v1387_v48 = vand.u32 127, %v124_v45  ;;  %vm422_vm8 = vcmask 588800  }
  0x16   :  { %v69_v5 = vadd.f32 %v68_v3, %v1288_v2  ;;  %s1208_s15 = smov 113   ;;  %s1209_s16 = smov 112   ;;  %v53_v51 = vld [vmem:[#allocation2 + $0x1] ss:$8 sm:$0xf]  ;;  %vm747_vm9 = vcmask 64512  }
  0x17   :  { %s1210_s17 = smov 111   ;;  %v1389_v50 = vsub.s32 1, %v133_v46  ;;  %v51_v52 = vld [vmem:[#allocation2] ss:$8 sm:$0xf]  ;;  %vm126_vm0 = vcmp.lt.s32.totalorder %v1387_v48, 17 }
  0x18   :  { %v70_v6 = vadd.f32 %v69_v5, %v1295_v4  ;;  %vm164_vm1 = vcmp.lt.s32.totalorder %v1387_v48, 16  ;;  %v1405_v61 = vsub.s32 0, %v133_v46  ;;  %vm202_vm2 = vcmp.lt.s32.totalorder %v1387_v48, 15 }
  0x19   :  { %v1394_v55 = vrot.slane %v51_v52, %v1389_v50  ;;  %v1397_v56 = vrot.slane %v53_v51, %v1389_v50  ;;  %vm240_vm3 = vcmp.lt.s32.totalorder %v1387_v48, 1  ;;  %vm278_vm4 = vcmp.lt.s32.totalorder %v1387_v48, 127 }
  0x1a   :  { %71 = vadd.xlane.f32.xlu0 %v70_v6  ;;  %vm316_vm5 = vcmp.lt.s32.totalorder %v1387_v48, 113  ;;  %vm354_vm6 = vcmp.lt.s32.totalorder %v1387_v48, 112  ;;  %vm392_vm7 = vcmp.lt.s32.totalorder %v1387_v48, 111 }
  0xa7   :  { %v72_v7 = vpop.xlane.xlu0 %71 }
  0xa8   :  { %v73_v8 = vmul.f32 0.001953125, %v72_v7  ;;  %v1409_v7 = vsub.s32 2, %v133_v46 }
  0xaa   :  { %v74_v9 = vsub.f32 %v1278_v0, %v73_v8  ;;  %v75_v10 = vsub.f32 %v1283_v1, %v73_v8  ;;  %v76_v11 = vsub.f32 %v1288_v2, %v73_v8  ;;  %v77_v12 = vsub.f32 %v1295_v4, %v73_v8 }
  0xac   :  { %v78_v13 = vmul.f32 %v74_v9, %v74_v9  ;;  %v79_v14 = vmul.f32 %v75_v10, %v75_v10  ;;  %v80_v15 = vmul.f32 %v76_v11, %v76_v11  ;;  %v81_v17 = vmul.f32 %v77_v12, %v77_v12 }
  0xad   :  { %v1414_v9 = vrot.slane %v51_v52, %v1405_v61  ;;  %v1417_v10 = vrot.slane %v53_v51, %v1405_v61 }
  0xae   :  { %v82_v16 = vadd.f32 %v79_v14, %v78_v13  ;;  %v1422_v14 = vrot.slane %v53_v51, %v1409_v7 }
  0xb0   :  { %v83_v18 = vadd.f32 %v82_v16, %v80_v15 }
  0xb2   :  { %v84_v19 = vadd.f32 %v83_v18, %v81_v17 }
  0xb4   :  { %85 = vadd.xlane.f32.xlu0 %v84_v19  ;;  %v1432_v19 = vrot.slane %v51_v52, %v1409_v7 }
 0x141   :  { %v86_v21 = vpop.xlane.xlu0 %85 }
 0x142   :  { %v87_v22 = vmul.f32 0.001953125, %v86_v21 }
 0x144   :  { %v88_v23 = vadd.f32 1e-05, %v87_v22 }
 0x146   :  { %1147 = vrsqrt.f32 %v88_v23 }
 0x150   :  { %v1148_v25 = vpop.eup %1147 }
 0x151   :  { %v90_v26 = vmul.f32 %v1148_v25, %v66_v24 }
 0x153   :  { %93 = vperm.xlu1 %1145, %v90_v26   ;;  %v100_v28 = vmul.f32 %v90_v26, %v73_v8  ;;  %v1411_v8 = vsub.s32 3, %v133_v46 }
 0x155   :  { %v101_v29 = vsub.f32 %v67_v27, %v100_v28  ;;  %v1427_v16 = vrot.slane %v53_v51, %v1411_v8  ;;  %v1435_v20 = vrot.slane %v51_v52, %v1411_v8 }
 0x157   :  { %104 = vperm.xlu1 %1145, %v101_v29  }
 0x1d2   :  { %v94_v30 = vpop.permute.xlu1 %93 }
 0x1d3   :  { %v96_v31 = vmul.f32 %v94_v30, %v1278_v0  ;;  %v97_v32 = vmul.f32 %v94_v30, %v1283_v1  ;;  %v98_v34 = vmul.f32 %v94_v30, %v1288_v2  ;;  %v99_v41 = vmul.f32 %v94_v30, %v1295_v4 }
 0x1d6   :  { %v105_v33 = vpop.permute.xlu1 %104 }
 0x1d7   :  { %v107_v35 = vadd.f32 %v105_v33, %v96_v31  ;;  %v108_v36 = vadd.f32 %v105_v33, %v97_v32  ;;  %v109_v37 = vadd.f32 %v105_v33, %v98_v34  ;;  %v110_v42 = vadd.f32 %v105_v33, %v99_v41  ;;  %v55_v32 = vld [vmem:[#allocation2 + $0x2] ss:$8 sm:$0xf] }
 0x1d8   :  { %v1451_v41 = vrot.slane %v55_v32, %v1389_v50 }
 0x1d9   :  { %v1312_v38 = vmax.f32 %v107_v35, 0.0  ;;  %v1314_v39 = vmax.f32 %v108_v36, 0.0  ;;  %v1320_v40 = vmax.f32 %v109_v37, 0.0  ;;  %v1331_v43 = vmax.f32 %v110_v42, 0.0 }
 0x1da   :  { %v57_v37 = vld [vmem:[#allocation2 + $0x3] ss:$8 sm:$0xf] }
 0x1db   :  { %118 = vrot.lane.b32.xlu1 %v1314_v39, %s1203_s1  ;;  %116 = vrot.lane.b32.xlu0 %v1312_v38, %s1203_s1  ;;  %v1454_v42 = vrot.slane %v57_v37, %v1389_v50  ;;  %v1464_v52 = vrot.slane %v57_v37, %v1405_v61 }
 0x1df   :  { %156 = vrot.lane.b32.xlu1 %v1312_v38, %s1204_s2  ;;  %160 = vrot.lane.b32.xlu0 %v1320_v40, %s1204_s2 }
 0x1e3   :  { %158 = vrot.lane.b32.xlu1 %v1314_v39, %s1204_s2  ;;  %196 = vrot.lane.b32.xlu0 %v1314_v39, %s1205_s12 }
 0x1e7   :  { %122 = vrot.lane.b32.xlu1 %v1331_v43, %s1203_s1  ;;  %234 = vrot.lane.b32.xlu0 %v1314_v39, %s1206_s13 }
 0x1eb   :  { %162 = vrot.lane.b32.xlu1 %v1331_v43, %s1204_s2  ;;  %238 = vrot.lane.b32.xlu0 %v1331_v43, %s1206_s13 }
 0x1ef   :  { %120 = vrot.lane.b32.xlu1 %v1320_v40, %s1203_s1  ;;  %236 = vrot.lane.b32.xlu0 %v1320_v40, %s1206_s13 }
 0x1f3   :  { %194 = vrot.lane.b32.xlu1 %v1312_v38, %s1205_s12  ;;  %274 = vrot.lane.b32.xlu0 %v1320_v40, %s1207_s14 }
 0x1f7   :  { %232 = vrot.lane.b32.xlu1 %v1312_v38, %s1206_s13  ;;  %276 = vrot.lane.b32.xlu0 %v1331_v43, %s1207_s14 }
 0x1fb   :  { %200 = vrot.lane.b32.xlu1 %v1331_v43, %s1205_s12  ;;  %312 = vrot.lane.b32.xlu0 %v1320_v40, %s1208_s15 }
 0x1ff   :  { %198 = vrot.lane.b32.xlu1 %v1320_v40, %s1205_s12  ;;  %350 = vrot.lane.b32.xlu0 %v1320_v40, %s1209_s16 }
 0x203   :  { %272 = vrot.lane.b32.xlu1 %v1314_v39, %s1207_s14  ;;  %346 = vrot.lane.b32.xlu0 %v1312_v38, %s1209_s16 }
 0x207   :  { %270 = vrot.lane.b32.xlu1 %v1312_v38, %s1207_s14  ;;  %352 = vrot.lane.b32.xlu0 %v1331_v43, %s1209_s16 }
 0x20b   :  { %310 = vrot.lane.b32.xlu1 %v1314_v39, %s1208_s15  ;;  %388 = vrot.lane.b32.xlu0 %v1320_v40, %s1210_s17 }
 0x20f   :  { %348 = vrot.lane.b32.xlu1 %v1314_v39, %s1209_s16  ;;  %390 = vrot.lane.b32.xlu0 %v1331_v43, %s1210_s17 }
 0x213   :  { %308 = vrot.lane.b32.xlu1 %v1312_v38, %s1208_s15 }
 0x217   :  { %314 = vrot.lane.b32.xlu1 %v1331_v43, %s1208_s15 }
 0x21b   :  { %386 = vrot.lane.b32.xlu1 %v1314_v39, %s1210_s17 }
 0x21f   :  { %384 = vrot.lane.b32.xlu1 %v1312_v38, %s1210_s17 }
 0x24d   :  { %v119_v47 = vpop.permute.xlu1 %118  ;;  %v117_v49 = vpop.permute.xlu0 %116 }
 0x24e   :  { %v129_v57 = vsel %vm126_vm0, %v117_v49, %v119_v47 }
 0x24f   :  { %v153_v62 = vmul.f32 %v1394_v55, %v129_v57 }
 0x251   :  { %v157_v53 = vpop.permute.xlu1 %156  ;;  %v161_v54 = vpop.permute.xlu0 %160 }
 0x255   :  { %v159_v58 = vpop.permute.xlu1 %158  ;;  %v1401_v59 = vpop.permute.xlu0 %196 }
 0x256   :  { %v167_v60 = vsel %vm164_vm1, %v157_v53, %v159_v58  ;;  %v166_v21 = vsel %vm164_vm1, %v159_v58, %v161_v54 }
 0x257   :  { %v191_v63 = vmul.f32 %v1397_v56, %v167_v60  ;;  %v192_v28 = vmul.f32 %v1422_v14, %v166_v21 }
 0x259   :  { %v123_v3 = vpop.permute.xlu1 %122  ;;  %v235_v5 = vpop.permute.xlu0 %234  ;;  %v1063_v6 = vpack.c.bf16 %v191_v63, %v153_v62  ;;  %v1473_v62 = vrot.slane %v57_v37, %v1409_v7  ;;  %v1476_v63 = vrot.slane %v57_v37, %v1411_v8 }
 0x25a   :  { %v130_v11 = vsel %vm126_vm0, %v123_v3, %v117_v49 }
 0x25b   :  { %1064 = vmatprep.subr.bf16.mxu0 %v1063_v6  ;;  %v152_v17 = vmul.f32 %v1414_v9, %v130_v11 }
 0x25d   :  { %v163_v12 = vpop.permute.xlu1 %162  ;;  %v239_v13 = vpop.permute.xlu0 %238 }
 0x25e   :  { %v168_v15 = vsel %vm164_vm1, %v163_v12, %v157_v53  ;;  %v165_v22 = vsel %vm164_vm1, %v161_v54, %v163_v12  ;;  %v1468_v54 = vrot.slane %v55_v32, %v1405_v61  ;;  %v1483_v12 = vrot.slane %v55_v32, %v1409_v7 }
 0x25f   :  { %v190_v18 = vmul.f32 %v1417_v10, %v168_v15  ;;  %v193_v31 = vmul.f32 %v1427_v16, %v165_v22  ;;  %v1486_v15 = vrot.slane %v55_v32, %v1411_v8  ;;  %v59_v22 = vld [vmem:[#allocation2 + $0x5] ss:$8 sm:$0xf] }
 0x261   :  { %v121_v23 = vpop.permute.xlu1 %120  ;;  %v237_v24 = vpop.permute.xlu0 %236  ;;  %v1065_v25 = vpack.c.bf16 %v190_v18, %v152_v17 }
 0x262   :  { %v127_v26 = vsel %vm126_vm0, %v121_v23, %v123_v3  ;;  %v128_v27 = vsel %vm126_vm0, %v119_v47, %v121_v23  ;;  %v241_v17 = vsel %vm240_vm3, %v237_v24, %v239_v13  ;;  %v242_v18 = vsel %vm240_vm3, %v235_v5, %v237_v24 }
 0x263   :  { %v154_v29 = vmul.f32 %v1432_v19, %v128_v27  ;;  %1066 = vmatpush1.bf16.msra.mxu0 %v1065_v25  ;;  %v155_v30 = vmul.f32 %v1435_v20, %v127_v26 }
 0x265   :  { %v195_v33 = vpop.permute.xlu1 %194  ;;  %v275_v34 = vpop.permute.xlu0 %274  ;;  %v1079_v35 = vpack.c.bf16 %v193_v31, %v155_v30  ;;  %v1081_v36 = vpack.c.bf16 %v192_v28, %v154_v29  ;;  %v1500_v28 = vrot.slane %v59_v22, %v1389_v50  ;;  %v269_v29 = vmul.f32 %v1476_v63, %v241_v17 }
 0x266   :  { %v205_v45 = vsel %vm202_vm2, %v195_v33, %v1401_v59 }
 0x267   :  { %1080 = vmatprep.subr.bf16.mxu1 %v1079_v35  ;;  %v229_v51 = vmul.f32 %v1451_v41, %v205_v45  ;;  %v1516_v45 = vrot.slane %v59_v22, %v1405_v61 }
 0x268   :  { %1082 = vmatpush1.bf16.msra.mxu1 %v1081_v36 }
 0x269   :  { %v233_v46 = vpop.permute.xlu1 %232  ;;  %v277_v49 = vpop.permute.xlu0 %276 }
 0x26a   :  { %v243_v47 = vsel %vm240_vm3, %v233_v46, %v235_v5  ;;  %v244_v57 = vsel %vm240_vm3, %v239_v13, %v233_v46  ;;  %v268_v13 = vmul.f32 %v1473_v62, %v242_v18  ;;  %v279_v36 = vsel %vm278_vm4, %v275_v34, %v277_v49  ;;  %v63_v18 = vld [vmem:[#allocation2 + $0x7] ss:$8 sm:$0xf] }
 0x26b   :  { %v267_v53 = vmul.f32 %v1454_v42, %v243_v47  ;;  %v266_v6 = vmul.f32 %v1464_v52, %v244_v57  ;;  %v1519_v46 = vrot.slane %v59_v22, %v1411_v8 }
 0x26d   :  { %v201_v58 = vpop.permute.xlu1 %200  ;;  %v1067_v60 = vpack.c.bf16 %v267_v53, %v229_v51  ;;  %v1492_v21 = vpop.permute.xlu0 %312 }
 0x26e   :  { %v206_v3 = vsel %vm202_vm2, %v201_v58, %v195_v33  ;;  %v1508_v33 = vrot.slane %v59_v22, %v1409_v7 }
 0x26f   :  { %v228_v11 = vmul.f32 %v1468_v54, %v206_v3  ;;  %1068 = vmatprep.subr.bf16.mxu0 %v1067_v60 }
 0x270   :  { %v306_v53 = vmul.f32 %v1508_v33, %v279_v36 }
 0x271   :  { %v199_v23 = vpop.permute.xlu1 %198  ;;  %v1069_v25 = vpack.c.bf16 %v266_v6, %v228_v11  ;;  %v61_v6 = vld [vmem:[#allocation2 + $0x6] ss:$8 sm:$0xf] }
 0x272   :  { %v203_v26 = vsel %vm202_vm2, %v199_v23, %v201_v58  ;;  %v204_v27 = vsel %vm202_vm2, %v1401_v59, %v199_v23  ;;  %v351_v59 = vpop.permute.xlu0 %350  ;;  %v1089_v22 = vpack.c.bf16 %v306_v53, %v1320_v40  ;;  %v1534_v23 = vrot.slane %v61_v6, %v1389_v50 }
 0x273   :  { %v230_v5 = vmul.f32 %v1483_v12, %v204_v27  ;;  %v231_v24 = vmul.f32 %v1486_v15, %v203_v26  ;;  %1070 = vmatpush1.bf16.msra.mxu0 %v1069_v25  ;;  %v1547_v27 = vrot.slane %v63_v18, %v1405_v61 }
 0x275   :  { %v273_v30 = vpop.permute.xlu1 %272  ;;  %v1083_v31 = vpack.c.bf16 %v269_v29, %v231_v24  ;;  %v1085_v32 = vpack.c.bf16 %v268_v13, %v230_v5  ;;  %v1551_v29 = vrot.slane %v61_v6, %v1405_v61 }
 0x276   :  { %v280_v35 = vsel %vm278_vm4, %v273_v30, %v275_v34  ;;  %v347_v3 = vpop.permute.xlu0 %346 }
 0x277   :  { %v305_v37 = vmul.f32 %v1500_v28, %v280_v35  ;;  %1084 = vmatprep.subr.bf16.mxu1 %v1083_v31  ;;  %v1556_v31 = vrot.slane %v63_v18, %v1409_v7 }
 0x278   :  { %1086 = vmatpush1.bf16.msra.mxu1 %v1085_v32  ;;  %v1559_v32 = vrot.slane %v63_v18, %v1411_v8 }
 0x279   :  { %v271_v47 = vpop.permute.xlu1 %270  ;;  %v1071_v51 = vpack.c.bf16 %v305_v37, %v1314_v39 }
 0x27a   :  { %v281_v57 = vsel %vm278_vm4, %v271_v47, %v273_v30  ;;  %v282_v34 = vsel %vm278_vm4, %v277_v49, %v271_v47  ;;  %v1537_v49 = vrot.slane %v63_v18, %v1389_v50  ;;  %v1566_v47 = vrot.slane %v61_v6, %v1409_v7 }
 0x27b   :  { %v304_v58 = vmul.f32 %v1516_v45, %v281_v57  ;;  %v307_v60 = vmul.f32 %v1519_v46, %v282_v34  ;;  %1072 = vmatprep.subr.bf16.mxu0 %v1071_v51  ;;  %v1569_v51 = vrot.slane %v61_v6, %v1411_v8 }
 0x27d   :  { %v311_v11 = vpop.permute.xlu1 %310  ;;  %v1073_v39 = vpack.c.bf16 %v304_v58, %v1312_v38  ;;  %v1087_v17 = vpack.c.bf16 %v307_v60, %v1331_v43  ;;  %v353_v43 = vpop.permute.xlu0 %352  ;;  %v65_v58 = vld [vmem:[#allocation2 + $0x20] ss:$8 sm:$0xf] }
 0x27e   :  { %v318_v25 = vsel %vm316_vm5, %v311_v11, %v1492_v21  ;;  %v355_v53 = vsel %vm354_vm6, %v351_v59, %v353_v43  ;;  %v358_v57 = vsel %vm354_vm6, %v353_v43, %v347_v3  ;;  %v1581_v6 = vrot.slane %v65_v58, %v1389_v50 }
 0x27f   :  { %1074 = vmatpush1.bf16.msra.mxu0 %v1073_v39  ;;  %1088 = vmatprep.subr.bf16.mxu1 %v1087_v17  ;;  %v343_v26 = vmul.f32 %v1534_v23, %v318_v25  ;;  %v382_v18 = vmul.f32 %v1556_v31, %v355_v53 }
 0x280   :  { %1090 = vmatpush1.bf16.msra.mxu1 %v1089_v22 }
 0x281   :  { %v349_v38 = vpop.permute.xlu1 %348  ;;  %v389_v34 = vpop.permute.xlu0 %388 }
 0x282   :  { %v356_v40 = vsel %vm354_vm6, %v349_v38, %v351_v59  ;;  %v357_v5 = vsel %vm354_vm6, %v347_v3, %v349_v38  ;;  %v383_v59 = vmul.f32 %v1559_v32, %v358_v57 }
 0x283   :  { %v381_v13 = vmul.f32 %v1537_v49, %v356_v40  ;;  %v380_v36 = vmul.f32 %v1547_v27, %v357_v5  ;;  %v1598_v5 = vrot.slane %v65_v58, %v1409_v7  ;;  %v115_v7 = vld [vmem:[%s1825_s5] sm:$0xff] }
 0x285   :  { %v309_v24 = vpop.permute.xlu1 %308  ;;  %v1075_v30 = vpack.c.bf16 %v381_v13, %v343_v26  ;;  %v391_v43 = vpop.permute.xlu0 %390  ;;  %v1592_v26 = vrot.slane %v65_v58, %v1405_v61  ;;  %v1595_v13 = vrot.slane %v65_v58, %v1411_v8 }
 0x286   :  { %v319_v35 = vsel %vm316_vm5, %v309_v24, %v311_v11 }
 0x287   :  { %v342_v37 = vmul.f32 %v1551_v29, %v319_v35  ;;  %1076 = vmatprep.subr.bf16.mxu0 %v1075_v30 }
 0x289   :  { %v315_v60 = vpop.permute.xlu1 %314  ;;  %v1077_v11 = vpack.c.bf16 %v380_v36, %v342_v37 }
 0x28a   :  { %v317_v39 = vsel %vm316_vm5, %v1492_v21, %v315_v60  ;;  %v320_v17 = vsel %vm316_vm5, %v315_v60, %v309_v24  ;;  %v393_v24 = vsel %vm392_vm7, %v389_v34, %v391_v43 }
 0x28b   :  { %v344_v3 = vmul.f32 %v1566_v47, %v317_v39  ;;  %v345_v22 = vmul.f32 %v1569_v51, %v320_v17  ;;  %1078 = vmatpush1.bf16.msra.mxu0 %v1077_v11  ;;  %v420_v37 = vmul.f32 %v1598_v5, %v393_v24 }
 0x28d   :  { %v387_v25 = vpop.permute.xlu1 %386  ;;  %v1091_v38 = vpack.c.bf16 %v383_v59, %v345_v22  ;;  %v1093_v21 = vpack.c.bf16 %v382_v18, %v344_v3 }
 0x28e   :  { %v394_v40 = vsel %vm392_vm7, %v387_v25, %v389_v34 }
 0x28f   :  { %v419_v50 = vmul.f32 %v1581_v6, %v394_v40  ;;  %1092 = vmatprep.subr.bf16.mxu1 %v1091_v38 }
 0x290   :  { %1094 = vmatpush1.bf16.msra.mxu1 %v1093_v21 }
 0x291   :  { %v385_v30 = vpop.permute.xlu1 %384  ;;  %442 = vmatprep.subr.mxu0 %v419_v50 }
 0x292   :  { %v395_v35 = vsel %vm392_vm7, %v385_v30, %v387_v25  ;;  %v396_v36 = vsel %vm392_vm7, %v391_v43, %v385_v30  ;;  %v568_v30 = vld [vmem:[%s1823_s3] sm:$0xff] }
 0x293   :  { %v418_v61 = vmul.f32 %v1592_v26, %v395_v35  ;;  %v421_v8 = vmul.f32 %v1595_v13, %v396_v36 }
 0x295   :  { %443 = vmatpush1.msra.mxu0 %v418_v61  ;;  %513 = vmatprep.subr.mxu1 %v421_v8  ;;  %v569_v61 = vld [vmem:[%s1824_s4] sm:$0xff] }
 0x296   :  { %1057 = vmatmul.mubr.msk.f32.vlgmr.msra.gmra.mrb[0].mxu0 %vm422_vm8, %v115_v7  ;;  %514 = vmatpush1.msra.mxu1 %v420_v37 }
 0x297   :  { %1058 = vmatmul.mubr.msk.f32.vlgmr.msra.gmra.mrb[0].mxu1 %vm422_vm8, %v115_v7  ;;  %751 = vmatprep.subr.mxu0 %v1283_v1 }
 0x298   :  { %752 = vmatpush1.msra.mxu0 %v1278_v0  ;;  %822 = vmatprep.subr.mxu1 %v1295_v4 }
 0x299   :  { %815 = vmatprep.mubr.f32.mxu0 %v1211_v44  ;;  %823 = vmatpush1.msra.mxu1 %v1288_v2 }
 0x29a   :  { %886 = vmatprep.mubr.f32.mxu1 %v1211_v44 }
 0x369   :  { %v492_v53 = vpop.f32.mrb[0].mxu0 }
 0x36a   :  { %v494_v57 = vpop.f32.mrb[1].mxu0  ;;  %v563_v34 = vpop.f32.mrb[0].mxu1 }
 0x36b   :  { %v570_v58 = vadd.f32 %v494_v57, %v492_v53  ;;  %v565_v60 = vpop.f32.mrb[1].mxu1 }
 0x36d   :  { %v571_v11 = vadd.f32 %v570_v58, %v563_v34 }
 0x36f   :  { %v572_v39 = vadd.f32 %v571_v11, %v565_v60 }
 0x371   :  { %573 = vadd.xlane.f32.xlu1 %v572_v39 }
 0x3fe   :  { %v574_v17 = vpop.xlane.xlu1 %573 }
 0x3ff   :  { %v575_v1 = vmul.f32 0.001953125, %v574_v17 }
 0x401   :  { %v576_v18 = vsub.f32 %v492_v53, %v575_v1  ;;  %v577_v0 = vsub.f32 %v494_v57, %v575_v1  ;;  %v578_v59 = vsub.f32 %v563_v34, %v575_v1  ;;  %v579_v4 = vsub.f32 %v565_v60, %v575_v1 }
 0x403   :  { %v580_v3 = vmul.f32 %v576_v18, %v576_v18  ;;  %v581_v22 = vmul.f32 %v577_v0, %v577_v0  ;;  %v582_v25 = vmul.f32 %v578_v59, %v578_v59  ;;  %v583_v38 = vmul.f32 %v579_v4, %v579_v4 }
 0x405   :  { %v584_v2 = vadd.f32 %v581_v22, %v580_v3 }
 0x407   :  { %v585_v21 = vadd.f32 %v584_v2, %v582_v25 }
 0x409   :  { %v586_v43 = vadd.f32 %v585_v21, %v583_v38 }
 0x40b   :  { %587 = vadd.xlane.f32.xlu0 %v586_v43 }
 0x498   :  { %v588_v40 = vpop.xlane.xlu0 %587 }
 0x499   :  { %v589_v50 = vmul.f32 0.001953125, %v588_v40 }
 0x49b   :  { %v590_v24 = vadd.f32 1e-05, %v589_v50 }
 0x49d   :  { %1149 = vrsqrt.f32 %v590_v24 }
 0x4a7   :  { %v1150_v35 = vpop.eup %1149 }
 0x4a8   :  { %v592_v36 = vmul.f32 %v1150_v35, %v568_v30 }
 0x4aa   :  { %595 = vperm.xlu0 %1146, %v592_v36   ;;  %v602_v8 = vmul.f32 %v592_v36, %v575_v1 }
 0x4ac   :  { %v603_v7 = vsub.f32 %v569_v61, %v602_v8 }
 0x4ae   :  { %606 = vperm.xlu1 %1145, %v603_v7  }
 0x529   :  { %v596_v37 = vpop.permute.xlu0 %595 }
 0x52a   :  { %v598_v58 = vmul.f32 %v596_v37, %v492_v53  ;;  %v600_v11 = vmul.f32 %v596_v37, %v563_v34  ;;  %v599_v17 = vmul.f32 %v596_v37, %v494_v57  ;;  %v601_v22 = vmul.f32 %v596_v37, %v565_v60  ;;  %v746_v34 = vld [vmem:[%s1828_s8] sm:$0xff] }
 0x52b   :  { %1059 = vmatmul.mubr.msk.f32.vlgmr.msra.gmra.mrb[2].mxu0 %vm747_vm9, %v746_v34  ;;  %1060 = vmatmul.mubr.msk.f32.vlgmr.msra.gmra.mrb[2].mxu1 %vm747_vm9, %v746_v34 }
 0x52c   :  { %960 = vmatprep.mubr.f32.mxu0 %v1211_v44  ;;  %1031 = vmatprep.mubr.f32.mxu1 %v1211_v44 }
 0x52d   :  { %v607_v39 = vpop.permute.xlu1 %606 }
 0x52e   :  { %v609_v18 = vadd.f32 %v607_v39, %v598_v58  ;;  %v611_v0 = vadd.f32 %v607_v39, %v600_v11  ;;  %v610_v59 = vadd.f32 %v607_v39, %v599_v17  ;;  %v612_v53 = vadd.f32 %v607_v39, %v601_v22 }
 0x530   :  { %v1626_v4 = vmax.f32 %v609_v18, 0.0  ;;  %v1628_v3 = vmax.f32 %v611_v0, 0.0  ;;  %v1634_v1 = vmax.f32 %v610_v59, 0.0  ;;  %v1644_v57 = vmax.f32 %v612_v53, 0.0 }
 0x532   :  { %638 = vrot.lane.b32.xlu0 %v1628_v3, %s1204_s2  ;;  %618 = vrot.lane.b32.xlu1 %v1626_v4, %s1203_s1 }
 0x536   :  { %650 = vrot.lane.b32.xlu0 %v1626_v4, %s1205_s12  ;;  %620 = vrot.lane.b32.xlu1 %v1634_v1, %s1203_s1 }
 0x53a   :  { %654 = vrot.lane.b32.xlu0 %v1628_v3, %s1205_s12  ;;  %622 = vrot.lane.b32.xlu1 %v1628_v3, %s1203_s1 }
 0x53e   :  { %666 = vrot.lane.b32.xlu0 %v1626_v4, %s1206_s13  ;;  %624 = vrot.lane.b32.xlu1 %v1644_v57, %s1203_s1 }
 0x542   :  { %670 = vrot.lane.b32.xlu0 %v1628_v3, %s1206_s13  ;;  %634 = vrot.lane.b32.xlu1 %v1626_v4, %s1204_s2 }
 0x546   :  { %682 = vrot.lane.b32.xlu0 %v1626_v4, %s1207_s14  ;;  %636 = vrot.lane.b32.xlu1 %v1634_v1, %s1204_s2 }
 0x54a   :  { %686 = vrot.lane.b32.xlu0 %v1628_v3, %s1207_s14  ;;  %640 = vrot.lane.b32.xlu1 %v1644_v57, %s1204_s2 }
 0x54e   :  { %698 = vrot.lane.b32.xlu0 %v1626_v4, %s1208_s15  ;;  %652 = vrot.lane.b32.xlu1 %v1634_v1, %s1205_s12 }
 0x552   :  { %702 = vrot.lane.b32.xlu0 %v1628_v3, %s1208_s15  ;;  %656 = vrot.lane.b32.xlu1 %v1644_v57, %s1205_s12 }
 0x556   :  { %714 = vrot.lane.b32.xlu0 %v1626_v4, %s1209_s16  ;;  %668 = vrot.lane.b32.xlu1 %v1634_v1, %s1206_s13 }
 0x55a   :  { %718 = vrot.lane.b32.xlu0 %v1628_v3, %s1209_s16  ;;  %672 = vrot.lane.b32.xlu1 %v1644_v57, %s1206_s13 }
 0x55e   :  { %730 = vrot.lane.b32.xlu0 %v1626_v4, %s1210_s17  ;;  %684 = vrot.lane.b32.xlu1 %v1634_v1, %s1207_s14 }
 0x562   :  { %734 = vrot.lane.b32.xlu0 %v1628_v3, %s1210_s17  ;;  %688 = vrot.lane.b32.xlu1 %v1644_v57, %s1207_s14 }
 0x566   :  { %700 = vrot.lane.b32.xlu1 %v1634_v1, %s1208_s15 }
 0x56a   :  { %704 = vrot.lane.b32.xlu1 %v1644_v57, %s1208_s15 }
 0x56e   :  { %716 = vrot.lane.b32.xlu1 %v1634_v1, %s1209_s16 }
 0x572   :  { %720 = vrot.lane.b32.xlu1 %v1644_v57, %s1209_s16 }
 0x576   :  { %732 = vrot.lane.b32.xlu1 %v1634_v1, %s1210_s17 }
 0x57a   :  { %736 = vrot.lane.b32.xlu1 %v1644_v57, %s1210_s17 }
 0x5a4   :  { %v639_v44 = vpop.permute.xlu0 %638  ;;  %v619_v60 = vpop.permute.xlu1 %618 }
 0x5a8   :  { %v651_v25 = vpop.permute.xlu0 %650  ;;  %v621_v2 = vpop.permute.xlu1 %620 }
 0x5a9   :  { %v628_v24 = vsel %vm126_vm0, %v619_v60, %v621_v2 }
 0x5aa   :  { %v631_v61 = vmul.f32 %v628_v24, %v1394_v55 }
 0x5ac   :  { %v655_v38 = vpop.permute.xlu0 %654  ;;  %v623_v21 = vpop.permute.xlu1 %622 }
 0x5ad   :  { %v627_v11 = vsel %vm126_vm0, %v621_v2, %v623_v21 }
 0x5b0   :  { %v625_v43 = vpop.permute.xlu1 %624  ;;  %v667_v40 = vpop.permute.xlu0 %666 }
 0x5b1   :  { %v626_v37 = vsel %vm126_vm0, %v623_v21, %v625_v43  ;;  %v629_v58 = vsel %vm126_vm0, %v625_v43, %v619_v60  ;;  %v632_v60 = vmul.f32 %v627_v11, %v1432_v19 }
 0x5b2   :  { %v633_v59 = vmul.f32 %v626_v37, %v1435_v20 }
 0x5b4   :  { %v635_v50 = vpop.permute.xlu1 %634  ;;  %v671_v30 = vpop.permute.xlu0 %670 }
 0x5b8   :  { %v637_v35 = vpop.permute.xlu1 %636  ;;  %v683_v22 = vpop.permute.xlu0 %682 }
 0x5b9   :  { %v644_v36 = vsel %vm164_vm1, %v635_v50, %v637_v35  ;;  %v643_v8 = vsel %vm164_vm1, %v637_v35, %v639_v44 }
 0x5ba   :  { %v647_v7 = vmul.f32 %v644_v36, %v1397_v56  ;;  %v648_v18 = vmul.f32 %v643_v8, %v1422_v14  ;;  %v630_v56 = vmul.f32 %v629_v58, %v1414_v9 }
 0x5bc   :  { %v641_v39 = vpop.permute.xlu1 %640  ;;  %v1095_v17 = vpack.c.bf16 %v647_v7, %v631_v61  ;;  %v1113_v43 = vpack.c.bf16 %v648_v18, %v632_v60 }
 0x5bd   :  { %v642_v55 = vsel %vm164_vm1, %v639_v44, %v641_v39  ;;  %v645_v0 = vsel %vm164_vm1, %v641_v39, %v635_v50  ;;  %v687_v44 = vpop.permute.xlu0 %686 }
 0x5be   :  { %v646_v53 = vmul.f32 %v645_v0, %v1417_v10  ;;  %v649_v34 = vmul.f32 %v642_v55, %v1427_v16  ;;  %1096 = vmatprep.subr.bf16.mxu0 %v1095_v17 }
 0x5c0   :  { %v1097_v2 = vpack.c.bf16 %v646_v53, %v630_v56  ;;  %v653_v14 = vpop.permute.xlu1 %652  ;;  %v1111_v21 = vpack.c.bf16 %v649_v34, %v633_v59 }
 0x5c1   :  { %v660_v9 = vsel %vm202_vm2, %v651_v25, %v653_v14  ;;  %v699_v16 = vpop.permute.xlu0 %698  ;;  %v659_v8 = vsel %vm202_vm2, %v653_v14, %v655_v38 }
 0x5c2   :  { %1098 = vmatpush1.bf16.msra.mxu0 %v1097_v2  ;;  %1112 = vmatprep.subr.bf16.mxu1 %v1111_v21  ;;  %v663_v24 = vmul.f32 %v660_v9, %v1451_v41 }
 0x5c3   :  { %1114 = vmatpush1.bf16.msra.mxu1 %v1113_v43 }
 0x5c4   :  { %v657_v50 = vpop.permute.xlu1 %656 }
 0x5c5   :  { %v658_v36 = vsel %vm202_vm2, %v655_v38, %v657_v50  ;;  %v661_v61 = vsel %vm202_vm2, %v657_v50, %v651_v25  ;;  %v664_v38 = vmul.f32 %v659_v8, %v1483_v12  ;;  %v703_v18 = vpop.permute.xlu0 %702 }
 0x5c6   :  { %v665_v39 = vmul.f32 %v658_v36, %v1486_v15 }
 0x5c8   :  { %v669_v20 = vpop.permute.xlu1 %668 }
 0x5c9   :  { %v676_v10 = vsel %vm240_vm3, %v667_v40, %v669_v20  ;;  %v675_v19 = vsel %vm240_vm3, %v669_v20, %v671_v30  ;;  %v715_v34 = vpop.permute.xlu0 %714 }
 0x5ca   :  { %v679_v35 = vmul.f32 %v676_v10, %v1454_v42  ;;  %v680_v58 = vmul.f32 %v675_v19, %v1473_v62  ;;  %v662_v42 = vmul.f32 %v661_v61, %v1468_v54 }
 0x5cc   :  { %v673_v7 = vpop.permute.xlu1 %672  ;;  %v1099_v37 = vpack.c.bf16 %v679_v35, %v663_v24  ;;  %v1117_v56 = vpack.c.bf16 %v680_v58, %v664_v38 }
 0x5cd   :  { %v674_v41 = vsel %vm240_vm3, %v671_v30, %v673_v7  ;;  %v677_v11 = vsel %vm240_vm3, %v673_v7, %v667_v40 }
 0x5ce   :  { %v678_v17 = vmul.f32 %v677_v11, %v1464_v52  ;;  %v681_v25 = vmul.f32 %v674_v41, %v1476_v63  ;;  %1100 = vmatprep.subr.bf16.mxu0 %v1099_v37 }
 0x5d0   :  { %v1101_v55 = vpack.c.bf16 %v678_v17, %v662_v42  ;;  %v685_v62 = vpop.permute.xlu1 %684  ;;  %v1115_v0 = vpack.c.bf16 %v681_v25, %v665_v39 }
 0x5d1   :  { %v691_v30 = vsel %vm278_vm4, %v685_v62, %v687_v44  ;;  %v692_v54 = vsel %vm278_vm4, %v683_v22, %v685_v62 }
 0x5d2   :  { %v694_v15 = vmul.f32 %v692_v54, %v1516_v45  ;;  %v695_v52 = vmul.f32 %v691_v30, %v1500_v28  ;;  %1102 = vmatpush1.bf16.msra.mxu0 %v1101_v55  ;;  %1116 = vmatprep.subr.bf16.mxu1 %v1115_v0 }
 0x5d3   :  { %1118 = vmatpush1.bf16.msra.mxu1 %v1117_v56 }
 0x5d4   :  { %v1105_v63 = vpack.c.bf16 %v694_v15, %v1626_v4  ;;  %v689_v12 = vpop.permute.xlu1 %688  ;;  %v1103_v40 = vpack.c.bf16 %v695_v52, %v1634_v1  ;;  %v719_v1 = vpop.permute.xlu0 %718 }
 0x5d5   :  { %v690_v59 = vsel %vm278_vm4, %v687_v44, %v689_v12  ;;  %v693_v53 = vsel %vm278_vm4, %v689_v12, %v683_v22 }
 0x5d6   :  { %v696_v60 = vmul.f32 %v690_v59, %v1508_v33  ;;  %v697_v45 = vmul.f32 %v693_v53, %v1519_v46  ;;  %1104 = vmatprep.subr.bf16.mxu0 %v1103_v40 }
 0x5d7   :  { %1106 = vmatpush1.bf16.msra.mxu0 %v1105_v63 }
 0x5d8   :  { %v1121_v28 = vpack.c.bf16 %v696_v60, %v1628_v3  ;;  %v701_v2 = vpop.permute.xlu1 %700  ;;  %v1119_v4 = vpack.c.bf16 %v697_v45, %v1644_v57  ;;  %v731_v43 = vpop.permute.xlu0 %730 }
 0x5d9   :  { %v707_v21 = vsel %vm316_vm5, %v701_v2, %v703_v18  ;;  %v708_v22 = vsel %vm316_vm5, %v699_v16, %v701_v2 }
 0x5da   :  { %1120 = vmatprep.subr.bf16.mxu1 %v1119_v4  ;;  %v710_v57 = vmul.f32 %v708_v22, %v1551_v29  ;;  %v711_v44 = vmul.f32 %v707_v21, %v1534_v23 }
 0x5db   :  { %1122 = vmatpush1.bf16.msra.mxu1 %v1121_v28 }
 0x5dc   :  { %v705_v14 = vpop.permute.xlu1 %704 }
 0x5dd   :  { %v706_v20 = vsel %vm316_vm5, %v703_v18, %v705_v14  ;;  %v709_v10 = vsel %vm316_vm5, %v705_v14, %v699_v16  ;;  %v735_v16 = vpop.permute.xlu0 %734 }
 0x5de   :  { %v712_v23 = vmul.f32 %v706_v20, %v1566_v47 }
 0x5e0   :  { %v717_v33 = vpop.permute.xlu1 %716 }
 0x5e1   :  { %v723_v46 = vsel %vm354_vm6, %v717_v33, %v719_v1  ;;  %v724_v3 = vsel %vm354_vm6, %v715_v34, %v717_v33 }
 0x5e2   :  { %v726_v50 = vmul.f32 %v724_v3, %v1547_v27  ;;  %v727_v9 = vmul.f32 %v723_v46, %v1537_v49  ;;  %v713_v27 = vmul.f32 %v709_v10, %v1569_v51 }
 0x5e4   :  { %v1109_v24 = vpack.c.bf16 %v726_v50, %v710_v57  ;;  %v721_v19 = vpop.permute.xlu1 %720  ;;  %v1107_v35 = vpack.c.bf16 %v727_v9, %v711_v44 }
 0x5e5   :  { %v722_v36 = vsel %vm354_vm6, %v719_v1, %v721_v19  ;;  %v725_v29 = vsel %vm354_vm6, %v721_v19, %v715_v34 }
 0x5e6   :  { %v728_v49 = vmul.f32 %v722_v36, %v1556_v31  ;;  %v729_v61 = vmul.f32 %v725_v29, %v1559_v32  ;;  %1108 = vmatprep.subr.bf16.mxu0 %v1107_v35  ;;  %v617_v31 = vld [vmem:[%s1826_s6] sm:$0xff]  ;;  %s1212_s6 = smov [#allocation5]  }
 0x5e7   :  { %1110 = vmatpush1.bf16.msra.mxu0 %v1109_v24  ;;  %s1048_s24 = sshll.u32 %s1212_s6, 4  ;;  %s1049_s24 = int_to_ptr.vmem [resolvable:$true] %s1048_s24 }
 0x5e8   :  { %v1125_v8 = vpack.c.bf16 %v728_v49, %v712_v23  ;;  %v733_v7 = vpop.permute.xlu1 %732  ;;  %v1123_v37 = vpack.c.bf16 %v729_v61, %v713_v27  ;;  %s1173_s25 = scalar_lea.vmem %s1049_s24, 512  ;;  %p1178_p9 = scmp.lt.s32.totalorder %s1049_s24, %s1049_s24 }
 0x5e9   :  { %v739_v58 = vsel %vm392_vm7, %v733_v7, %v735_v16  ;;  %v740_v41 = vsel %vm392_vm7, %v731_v43, %v733_v7  ;;  %p1174_p8 = scmp.ne.s32.totalorder %s1049_s24, %s1173_s25  ;;  %p1179_p10 = scmp.lt.s32.totalorder %s1173_s25, %s1173_s25 }
 0x5ea   :  { %v742_v47 = vmul.f32 %v740_v41, %v1592_v26  ;;  %v743_v51 = vmul.f32 %v739_v58, %v1581_v6  ;;  %1124 = vmatprep.subr.bf16.mxu1 %v1123_v37 }
 0x5eb   :  { %1126 = vmatpush1.bf16.msra.mxu1 %v1125_v8  ;;  %p1180_p11 = por %p1179_p10, %p1178_p9 }
 0x5ec   :  { %912 = vmatprep.subr.mxu0 %v743_v51  ;;  %v737_v32 = vpop.permute.xlu1 %736 }
 0x5ed   :  { %v738_v11 = vsel %vm392_vm7, %v735_v16, %v737_v32  ;;  %v741_v42 = vsel %vm392_vm7, %v737_v32, %v731_v43  ;;  %913 = vmatpush1.msra.mxu0 %v742_v47  ;;  %p1181_p12 = pnand %p1180_p11, %p1174_p8 }
 0x5ee   :  { %v744_v39 = vmul.f32 %v738_v11, %v1598_v5  ;;  %v745_v26 = vmul.f32 %v741_v42, %v1595_v13  ;;  %1061 = vmatmul.mubr.msk.f32.vlgmr.msra.gmra.mrb[2].mxu0 %vm422_vm8, %v617_v31 }
 0x5f0   :  { %983 = vmatprep.subr.mxu1 %v745_v26 }
 0x5f1   :  { %984 = vmatpush1.msra.mxu1 %v744_v39 }
 0x5f2   :  { %1062 = vmatmul.mubr.msk.f32.vlgmr.msra.gmra.mrb[2].mxu1 %vm422_vm8, %v617_v31 }
 0x6c1   :  { %v962_v6 = vpop.f32.mrb[2].mxu0 }
 0x6c2   :  { %1038 = vst [vmem:[#allocation5] sm:$0xff] %v962_v6  ;;  %v964_v17 = vpop.f32.mrb[3].mxu0 }
 0x6c3   :  { %1039 = vst [vmem:[#allocation5 + $0x8] sm:$0xff] %v964_v17 }
 0x6c5   :  { %v1033_v25 = vpop.f32.mrb[2].mxu1 }
 0x6c6   :  { %1040 = vst [vmem:[#allocation5 + $0x10] sm:$0xff] %v1033_v25  ;;  %v1035_v48 = vpop.f32.mrb[3].mxu1 }
 0x6c7   :  { %1041 = vst [vmem:[#allocation5 + $0x18] sm:$0xff] %v1035_v48 }
 0x6c8   :  { %1184 = shalt.err (!%p1181_p12)
}
 0x6c9   :  { %s1185_s28 = scalar_lea.hbm %s1829_s9, 512 }
 0x6ca   :  { %p1186_p13 = scmp.ne.s32.totalorder %s1829_s9, %s1185_s28  ;;  %p1189_p0 = scmp.lt.u32.totalorder %s1185_s28, %s1829_s9 }
 0x6cc   :  { %p1191_p1 = pnand %p1189_p0, %p1186_p13 }
 0x6ce   :  { %1194 = shalt.err (!%p1191_p1)
}
 0x6cf   :  { %1051 = dma.vmem_to_hbm [thread:$0]  %s1049_s24, 512, %s1829_s9, [#allocation4]  }
 0x6d0   :  { %1197 = dma.done.wait [#allocation4], 512  }
 0x6d1   :  { %1198 = vsyncadd [#allocation4], 4294966784 }
 0x6d2   :  { %1055 = vsyncpa [#allocation3], 1 }
 0x6d3   :  { %1056 = vsyncpa [#allocation4], 1 }

</bundles_post_ra>
